<compile_context>
chip_gen: v6e
topology: v6e:2x2x1
jax: 0.10.0
libtpu: 0.0.40
codegen_flags: <defaults>
</compile_context>

<pallas_src>
import math
from functools import partial

import jax
import jax.numpy as jnp
from jax.experimental import pallas as pl
from jax.experimental.pallas import tpu as pltpu


# ----------------------------------------------------------------------------
# Kernels
# ----------------------------------------------------------------------------
def _attn_block_kernel(x_ref, wqkv_ref, bqkv_ref, wo_ref, bo_ref, g_ref, b_ref,
                       *rest, NH, DH, scale, eps, compute_gate):
    # One batch tile: x_ref is (Bt, S, H).  Computes
    #   x1 = LayerNorm(x + out_proj(MHA(x)))          -> o_ref
    #   logits = x1 @ gate_w (lane-padded)             -> logits_ref (optional)
    if compute_gate:
        wg_ref, o_ref, logits_ref = rest
    else:
        (o_ref,) = rest

    Bt, S, H = x_ref.shape
    x = x_ref[...].astype(jnp.float32).reshape(Bt * S, H)      # lane-dense rows
    xb = x.astype(jnp.bfloat16)

    # fused QKV projection (bf16 weights already, f32 accumulate)
    qkv = (jnp.dot(xb, wqkv_ref[...], preferred_element_type=jnp.float32)
           + bqkv_ref[...])                                    # (Bt*S, 3H) f32
    qkv3 = qkv.reshape(Bt, S, 3 * H)

    # Per-head attention, folded straight into the out projection (no concat,
    # no per-head outputs kept live).
    proj = jnp.zeros((Bt * S, H), jnp.float32)
    for h in range(NH):                                        # static unroll
        lo = h * DH
        q = qkv3[:, :, lo:lo + DH].astype(jnp.bfloat16)        # (Bt, S, DH)
        k = qkv3[:, :, H + lo:H + lo + DH].astype(jnp.bfloat16)
        v = qkv3[:, :, 2 * H + lo:2 * H + lo + DH].astype(jnp.bfloat16)

        s = jnp.einsum('bqd,bkd->bqk', q, k,
                       preferred_element_type=jnp.float32) * scale
        s = s - jnp.max(s, axis=-1, keepdims=True)
        p = jnp.exp(s)
        p = p / jnp.sum(p, axis=-1, keepdims=True)             # exact softmax
        head = jnp.einsum('bqk,bkd->bqd', p.astype(jnp.bfloat16), v,
                          preferred_element_type=jnp.float32)  # (Bt, S, DH)

        proj = proj + jnp.dot(head.reshape(Bt * S, DH).astype(jnp.bfloat16),
                              wo_ref[lo:lo + DH, :],
                              preferred_element_type=jnp.float32)
    proj = proj + bo_ref[...]

    # residual + LayerNorm (biased variance, torch semantics), f32 math
    z = x + proj
    mu = jnp.mean(z, axis=-1, keepdims=True)
    var = jnp.mean(jnp.square(z - mu), axis=-1, keepdims=True)
    x1 = (z - mu) * jax.lax.rsqrt(var + eps) * g_ref[...] + b_ref[...]

    o_ref[...] = x1.reshape(Bt, S, H).astype(o_ref.dtype)

    if compute_gate:
        # fused gate logits (lane-padded to 128 -> dense stores)
        logits = jnp.dot(x1.astype(jnp.bfloat16), wg_ref[...],
                         preferred_element_type=jnp.float32)
        logits_ref[...] = logits.reshape(Bt, S, logits_ref.shape[-1]
                                         ).astype(logits_ref.dtype)


def _moe_kernel(x_ref, wt_ref, w1_ref, b1_ref, w2_ref, b2_ref, g_ref, b_ref,
                o_ref, acc_ref, *, eps):
    # grid = (token_tiles, E); expert axis e is a trailing reduction into acc.
    e = pl.program_id(1)

    @pl.when(e == 0)
    def _init():
        acc_ref[...] = jnp.zeros_like(acc_ref)

    xb = x_ref[...].astype(jnp.bfloat16)
    h = (jnp.dot(xb, w1_ref[...], preferred_element_type=jnp.float32)
         + b1_ref[...])
    # exact GELU (erf), f32 math (matches torch.nn.GELU())
    h = 0.5 * h * (1.0 + jax.lax.erf(h * (1.0 / math.sqrt(2.0))))
    eo = (jnp.dot(h.astype(jnp.bfloat16), w2_ref[...],
                  preferred_element_type=jnp.float32)
          + b2_ref[...])                                       # (tn, H)

    # combine weights arrive pre-sliced as (tn, 1) -> plain broadcast multiply
    acc_ref[...] = acc_ref[...] + eo * wt_ref[...]

    @pl.when(e == pl.num_programs(1) - 1)
    def _finalize():
        z = x_ref[...].astype(jnp.float32) + acc_ref[...]
        mu = jnp.mean(z, axis=-1, keepdims=True)
        var = jnp.mean(jnp.square(z - mu), axis=-1, keepdims=True)
        zn = (z - mu) * jax.lax.rsqrt(var + eps)
        o_ref[...] = (zn * g_ref[...] + b_ref[...]).astype(o_ref.dtype)


# ----------------------------------------------------------------------------
# Pallas wrappers
# ----------------------------------------------------------------------------
def _vmem_limit(block_bytes, scratch_bytes=0):
    # 2x for double-buffered streamed blocks + slack for kernel temps.
    est = 2 * block_bytes + scratch_bytes + (4 << 20)
    return int(min(32 << 20, max(8 << 20, est)))


def _batch_tile(B, S, target_rows=256):
    if B * S <= target_rows:
        return B
    return max(1, min(B, target_rows // max(S, 1)))


def attention_block(x, wqkv, bqkv, wo, bo, g, b, *, num_heads, eps,
                    gate_w=None):
    B, S, H = x.shape
    DH = H // num_heads
    Bt = _batch_tile(B, S)
    nb = pl.cdiv(B, Bt)
    compute_gate = gate_w is not None

    kernel = partial(_attn_block_kernel, NH=num_heads, DH=DH,
                     scale=1.0 / math.sqrt(DH), eps=eps,
                     compute_gate=compute_gate)

    in_specs = [
        pl.BlockSpec((Bt, S, H), lambda i: (i, 0, 0)),        # x (batch tile)
        pl.BlockSpec((H, 3 * H), lambda i: (0, 0)),           # wqkv (bf16, resident)
        pl.BlockSpec((1, 3 * H), lambda i: (0, 0)),           # bqkv (f32)
        pl.BlockSpec((H, H), lambda i: (0, 0)),               # wo (bf16, resident)
        pl.BlockSpec((1, H), lambda i: (0, 0)),               # bo
        pl.BlockSpec((1, H), lambda i: (0, 0)),               # ln gamma
        pl.BlockSpec((1, H), lambda i: (0, 0)),               # ln beta
    ]
    args = [x, wqkv, bqkv[None, :], wo, bo[None, :], g[None, :], b[None, :]]
    out_specs = pl.BlockSpec((Bt, S, H), lambda i: (i, 0, 0))
    out_shape = jax.ShapeDtypeStruct((B, S, H), x.dtype)

    blk_bytes = (2 * Bt * S * H * 4 + H * 3 * H * 2 + 3 * H * 4
                 + H * H * 2 + 4 * H * 4)
    if compute_gate:
        GP = gate_w.shape[1]
        in_specs.append(pl.BlockSpec((H, GP), lambda i: (0, 0)))
        args.append(gate_w)
        out_specs = (out_specs, pl.BlockSpec((Bt, S, GP), lambda i: (i, 0, 0)))
        out_shape = (out_shape,
                     jax.ShapeDtypeStruct((B, S, GP), jnp.float32))
        blk_bytes += H * GP * 2 + Bt * S * GP * 4

    return pl.pallas_call(
        kernel,
        out_shape=out_shape,
        grid=(nb,),
        in_specs=in_specs,
        out_specs=out_specs,
        compiler_params=pltpu.CompilerParams(
            dimension_semantics=("parallel",),
            vmem_limit_bytes=_vmem_limit(blk_bytes)),
    )(*args)


def moe_block(x, weights_t, w1, b1, w2, b2, g, b, *, eps):
    # x: (N, H)   weights_t: (E, N, 1)   w1: (E, H, I) bf16   w2: (E, I, H) bf16
    N, H = x.shape
    E, _, I = w1.shape
    tn = N if N <= 512 else 512
    nt = pl.cdiv(N, tn)

    cost = pl.CostEstimate(
        flops=4 * N * H * I * E,
        transcendentals=N * I * E,
        bytes_accessed=(4 * 2 * N * H + 4 * N * E
                        + nt * E * (2 * H * I * 2 + (I + H) * 4) + 2 * H * 4),
    )
    blk_bytes = (3 * tn * H * 4 + tn * 128 * 4
                 + (H * I + I * H) * 2 + (I + H) * 4 + 2 * H * 4)

    return pl.pallas_call(
        partial(_moe_kernel, eps=eps),
        out_shape=jax.ShapeDtypeStruct((N, H), x.dtype),
        grid=(nt, E),
        in_specs=[
            pl.BlockSpec((tn, H), lambda i, e: (i, 0)),          # x1 (input + residual)
            pl.BlockSpec((None, tn, 1), lambda i, e: (e, i, 0)),  # combine weight slice
            pl.BlockSpec((None, H, I), lambda i, e: (e, 0, 0)),   # expert w1 (bf16)
            pl.BlockSpec((1, I), lambda i, e: (e, 0)),            # expert b1
            pl.BlockSpec((None, I, H), lambda i, e: (e, 0, 0)),   # expert w2 (bf16)
            pl.BlockSpec((1, H), lambda i, e: (e, 0)),            # expert b2
            pl.BlockSpec((1, H), lambda i, e: (0, 0)),            # ln gamma
            pl.BlockSpec((1, H), lambda i, e: (0, 0)),            # ln beta
        ],
        out_specs=pl.BlockSpec((tn, H), lambda i, e: (i, 0)),
        scratch_shapes=[pltpu.VMEM((tn, H), jnp.float32)],
        compiler_params=pltpu.CompilerParams(
            dimension_semantics=("parallel", "arbitrary"),
            vmem_limit_bytes=_vmem_limit(blk_bytes, tn * H * 4)),
        cost_estimate=cost,
    )(x, weights_t, w1, b1, w2, b2, g[None, :], b[None, :])


# ----------------------------------------------------------------------------
# TopPMoE forward (mirrors the PyTorch module, eval mode)
# ----------------------------------------------------------------------------
def init_params(key, cfg):
    H, I, E = cfg["hidden_size"], cfg["intermediate_size"], cfg["num_experts"]
    GP = ((E + 127) // 128) * 128           # lane-padded gate width
    ks = jax.random.split(key, 9)
    s = 0.02
    # Matmul weights stored pre-transposed (math layout = torch weight.T) and
    # in bf16 (MXU input dtype) once at init; biases / LN params stay f32.
    gate_w = jax.random.normal(ks[8], (H, E), jnp.float32) * s
    gate_w_p = jnp.zeros((H, GP), jnp.float32).at[:, :E].set(gate_w)
    return dict(
        in_proj_w=(jax.random.normal(ks[0], (H, 3 * H), jnp.float32) * s
                   ).astype(jnp.bfloat16),
        in_proj_b=jax.random.normal(ks[1], (3 * H,), jnp.float32) * s,
        out_proj_w=(jax.random.normal(ks[2], (H, H), jnp.float32) * s
                    ).astype(jnp.bfloat16),
        out_proj_b=jax.random.normal(ks[3], (H,), jnp.float32) * s,
        attn_ln_g=jnp.ones((H,), jnp.float32),
        attn_ln_b=jnp.zeros((H,), jnp.float32),
        w1=(jax.random.normal(ks[4], (E, H, I), jnp.float32) * s
            ).astype(jnp.bfloat16),
        b1=jax.random.normal(ks[5], (E, I), jnp.float32) * s,
        w2=(jax.random.normal(ks[6], (E, I, H), jnp.float32) * s
            ).astype(jnp.bfloat16),
        b2=jax.random.normal(ks[7], (E, H), jnp.float32) * s,
        gate_w=gate_w_p.astype(jnp.bfloat16),                 # (H, GP) padded
        ffn_ln_g=jnp.ones((H,), jnp.float32),
        ffn_ln_b=jnp.zeros((H,), jnp.float32),
    )


def top_p_moe_forward(params, x, cfg, training_phase=1):
    B, S, H = x.shape
    NH = cfg["num_attention_heads"]
    E = cfg["num_experts"]
    N = B * S

    # ---- fused attention block: x1 = LN(x + out_proj(MHA(x, x, x))) ----
    # (gate logits fused into the same kernel when the gated path is active)
    if training_phase == 1:
        x1 = attention_block(
            x, params["in_proj_w"], params["in_proj_b"],
            params["out_proj_w"], params["out_proj_b"],
            params["attn_ln_g"], params["attn_ln_b"],
            num_heads=NH, eps=1e-12)                            # (B, S, H)
        # mean over experts == uniform weights 1/E
        weights_t = jnp.full((E, N, 1), 1.0 / E, dtype=jnp.float32)
        gates = None
    else:
        x1, logits_p = attention_block(
            x, params["in_proj_w"], params["in_proj_b"],
            params["out_proj_w"], params["out_proj_b"],
            params["attn_ln_g"], params["attn_ln_b"],
            num_heads=NH, eps=1e-12, gate_w=params["gate_w"])
        logits = logits_p.reshape(N, -1)[:, :E]                 # strip lane pad
        gates = jax.nn.softmax(logits, axis=-1)
        sorted_g = -jnp.sort(-gates, axis=-1)                   # descending
        cums = jnp.cumsum(sorted_g, axis=-1)
        # NOTE: mirrors the reference exactly — its cat([...,:1])[...,:-1] is a
        # no-op, and the sorted-order mask is applied to the unsorted gates.
        mask = (cums < cfg["p_threshold"]).astype(gates.dtype)
        gates = gates * mask
        gates = gates / (jnp.sum(gates, axis=-1, keepdims=True) + 1e-10)
        weights_t = jnp.transpose(gates)[:, :, None]            # (E, N, 1)

    x1f = x1.reshape(N, H)                                      # free (contiguous)

    # ---- fused MoE block: LN(x1 + sum_e w[e] * expert_e(x1)) ----
    out = moe_block(x1f, weights_t, params["w1"], params["b1"],
                    params["w2"], params["b2"],
                    params["ffn_ln_g"], params["ffn_ln_b"], eps=1e-12)  # (N, H)

    if training_phase == 1:
        lbl = jnp.zeros((), jnp.float32)
    else:
        lbl = jnp.mean(jnp.square(jnp.mean(gates, axis=0) - 1.0 / E))

    return out.reshape(B, S, H), lbl


# ----------------------------------------------------------------------------
if __name__ == "__main__":
    cfg = dict(hidden_size=128, num_attention_heads=4, intermediate_size=256,
               num_experts=4, dropout_rate=0.1, p_threshold=0.9)
    key = jax.random.PRNGKey(0)
    pkey, xkey = jax.random.split(key)
    params = init_params(pkey, cfg)

    batch, seq = 2, 8
    x = jax.random.normal(xkey, (batch, seq, cfg["hidden_size"]), jnp.float32)

    # default module state (training_phase == 1): mean over experts, loss == 0
    out1, loss1 = top_p_moe_forward(params, x, cfg, training_phase=1)
    # top-p gated path (training_phase == 2)
    out2, loss2 = top_p_moe_forward(params, x, cfg, training_phase=2)

    jax.block_until_ready((out1, loss1, out2, loss2))
    assert out1.shape == x.shape and out2.shape == x.shape
    assert jnp.isfinite(out1).all() and jnp.isfinite(out2).all()
    assert jnp.isfinite(loss1).all() and jnp.isfinite(loss2).all()
    print("KERNEL_OK")
</pallas_src>

<mosaic_0001>
module attributes {stable_mosaic.version = 11 : i64} {
  func.func @_attn_block_kernel(%arg0: i32, %arg1: memref<2x8x128xf32, #tpu.memory_space<vmem>>, %arg2: memref<128x384xbf16, #tpu.memory_space<vmem>>, %arg3: memref<1x384xf32, #tpu.memory_space<vmem>>, %arg4: memref<128x128xbf16, #tpu.memory_space<vmem>>, %arg5: memref<1x128xf32, #tpu.memory_space<vmem>>, %arg6: memref<1x128xf32, #tpu.memory_space<vmem>>, %arg7: memref<1x128xf32, #tpu.memory_space<vmem>>, %arg8: memref<2x8x128xf32, #tpu.memory_space<vmem>>) attributes {dimension_semantics = [#tpu.dimension_semantics<parallel>], iteration_bounds = array<i64: 1>, scalar_prefetch = 0 : i64, scratch_operands = 0 : i64, tpu.core_type = #tpu.core_type<tc>, window_params = [{transform_indices = @transform_0, window_bounds = array<i64: 2, 8, 128>}, {pipeline_mode = #tpu.pipeline_mode<synchronous>, transform_indices = @transform_1, window_bounds = array<i64: 128, 384>}, {pipeline_mode = #tpu.pipeline_mode<synchronous>, transform_indices = @transform_2, window_bounds = array<i64: 1, 384>}, {pipeline_mode = #tpu.pipeline_mode<synchronous>, transform_indices = @transform_3, window_bounds = array<i64: 128, 128>}, {pipeline_mode = #tpu.pipeline_mode<synchronous>, transform_indices = @transform_4, window_bounds = array<i64: 1, 128>}, {pipeline_mode = #tpu.pipeline_mode<synchronous>, transform_indices = @transform_5, window_bounds = array<i64: 1, 128>}, {pipeline_mode = #tpu.pipeline_mode<synchronous>, transform_indices = @transform_6, window_bounds = array<i64: 1, 128>}, {transform_indices = @transform_7, window_bounds = array<i64: 2, 8, 128>}]} {
    %c0 = arith.constant 0 : index
    %c0_0 = arith.constant 0 : index
    %c0_1 = arith.constant 0 : index
    %0 = vector.load %arg1[%c0, %c0_0, %c0_1] : memref<2x8x128xf32, #tpu.memory_space<vmem>>, vector<2x8x128xf32>
    %1 = vector.shape_cast %0 : vector<2x8x128xf32> to vector<16x128xf32>
    %2 = arith.truncf %1 : vector<16x128xf32> to vector<16x128xbf16>
    %c0_2 = arith.constant 0 : index
    %c0_3 = arith.constant 0 : index
    %3 = vector.load %arg2[%c0_2, %c0_3] : memref<128x384xbf16, #tpu.memory_space<vmem>>, vector<128x384xbf16>
    %cst = arith.constant dense<0.000000e+00> : vector<16x384xf32>
    %4 = tpu.matmul %2, %3, %cst {dimension_numbers = #tpu.dot_dimension_numbers<[1], [0], [0], [1], [0, 0, 1, 1], [], []>} : vector<16x128xbf16>, vector<128x384xbf16>, vector<16x384xf32> -> vector<16x384xf32>
    %c0_4 = arith.constant 0 : index
    %c0_5 = arith.constant 0 : index
    %5 = vector.load %arg3[%c0_4, %c0_5] : memref<1x384xf32, #tpu.memory_space<vmem>>, vector<1x384xf32>
    %6 = vector.broadcast %5 : vector<1x384xf32> to vector<16x384xf32>
    %7 = arith.addf %4, %6 : vector<16x384xf32>
    %8 = vector.shape_cast %7 : vector<16x384xf32> to vector<2x8x384xf32>
    %cst_6 = arith.constant 0.000000e+00 : f32
    %9 = vector.broadcast %cst_6 : f32 to vector<16x128xf32>
    %10 = vector.extract_strided_slice %8 {offsets = [0, 0, 0], sizes = [2, 8, 32], strides = [1, 1, 1]} : vector<2x8x384xf32> to vector<2x8x32xf32>
    %11 = arith.truncf %10 : vector<2x8x32xf32> to vector<2x8x32xbf16>
    %12 = vector.extract_strided_slice %8 {offsets = [0, 0, 128], sizes = [2, 8, 32], strides = [1, 1, 1]} : vector<2x8x384xf32> to vector<2x8x32xf32>
    %13 = arith.truncf %12 : vector<2x8x32xf32> to vector<2x8x32xbf16>
    %14 = vector.extract_strided_slice %8 {offsets = [0, 0, 256], sizes = [2, 8, 32], strides = [1, 1, 1]} : vector<2x8x384xf32> to vector<2x8x32xf32>
    %15 = arith.truncf %14 : vector<2x8x32xf32> to vector<2x8x32xbf16>
    "tpu.trace_start"() <{level = 10 : i32, message = "bqd,bkd->bqk"}> : () -> ()
    %cst_7 = arith.constant dense<0.000000e+00> : vector<2x8x8xf32>
    %16 = tpu.matmul %11, %13, %cst_7 {dimension_numbers = #tpu.dot_dimension_numbers<[2], [2], [1], [1], [0, 0, 0, 1, 1, 1], [0], [0]>} : vector<2x8x32xbf16>, vector<2x8x32xbf16>, vector<2x8x8xf32> -> vector<2x8x8xf32>
    "tpu.trace_stop"() : () -> ()
    %cst_8 = arith.constant 0.176776692 : f32
    %17 = vector.broadcast %cst_8 : f32 to vector<2x8x8xf32>
    %18 = arith.mulf %16, %17 : vector<2x8x8xf32>
    %cst_9 = arith.constant dense<0xFF800000> : vector<2x8xf32>
    %19 = vector.multi_reduction <maximumf>, %18, %cst_9 [2] : vector<2x8x8xf32> to vector<2x8xf32>
    %20 = vector.shape_cast %19 : vector<2x8xf32> to vector<2x8x1xf32>
    %21 = vector.broadcast %20 : vector<2x8x1xf32> to vector<2x8x8xf32>
    %22 = arith.subf %18, %21 : vector<2x8x8xf32>
    %23 = math.exp %22 : vector<2x8x8xf32>
    %cst_10 = arith.constant dense<0.000000e+00> : vector<2x8xf32>
    %24 = vector.multi_reduction <add>, %23, %cst_10 [2] : vector<2x8x8xf32> to vector<2x8xf32>
    %25 = vector.shape_cast %24 : vector<2x8xf32> to vector<2x8x1xf32>
    %26 = vector.broadcast %25 : vector<2x8x1xf32> to vector<2x8x8xf32>
    %27 = arith.divf %23, %26 : vector<2x8x8xf32>
    %28 = arith.truncf %27 : vector<2x8x8xf32> to vector<2x8x8xbf16>
    "tpu.trace_start"() <{level = 10 : i32, message = "bqk,bkd->bqd"}> : () -> ()
    %cst_11 = arith.constant dense<0.000000e+00> : vector<2x8x32xf32>
    %29 = tpu.matmul %28, %15, %cst_11 {dimension_numbers = #tpu.dot_dimension_numbers<[2], [1], [1], [2], [0, 0, 0, 1, 1, 2], [0], [0]>} : vector<2x8x8xbf16>, vector<2x8x32xbf16>, vector<2x8x32xf32> -> vector<2x8x32xf32>
    "tpu.trace_stop"() : () -> ()
    %30 = vector.shape_cast %29 : vector<2x8x32xf32> to vector<16x32xf32>
    %31 = arith.truncf %30 : vector<16x32xf32> to vector<16x32xbf16>
    %c0_12 = arith.constant 0 : index
    %c0_13 = arith.constant 0 : index
    %32 = vector.load %arg4[%c0_12, %c0_13] : memref<128x128xbf16, #tpu.memory_space<vmem>>, vector<32x128xbf16>
    %cst_14 = arith.constant dense<0.000000e+00> : vector<16x128xf32>
    %33 = tpu.matmul %31, %32, %cst_14 {dimension_numbers = #tpu.dot_dimension_numbers<[1], [0], [0], [1], [0, 0, 1, 1], [], []>} : vector<16x32xbf16>, vector<32x128xbf16>, vector<16x128xf32> -> vector<16x128xf32>
    %34 = arith.addf %9, %33 : vector<16x128xf32>
    %35 = vector.extract_strided_slice %8 {offsets = [0, 0, 32], sizes = [2, 8, 32], strides = [1, 1, 1]} : vector<2x8x384xf32> to vector<2x8x32xf32>
    %36 = arith.truncf %35 : vector<2x8x32xf32> to vector<2x8x32xbf16>
    %37 = vector.extract_strided_slice %8 {offsets = [0, 0, 160], sizes = [2, 8, 32], strides = [1, 1, 1]} : vector<2x8x384xf32> to vector<2x8x32xf32>
    %38 = arith.truncf %37 : vector<2x8x32xf32> to vector<2x8x32xbf16>
    %39 = vector.extract_strided_slice %8 {offsets = [0, 0, 288], sizes = [2, 8, 32], strides = [1, 1, 1]} : vector<2x8x384xf32> to vector<2x8x32xf32>
    %40 = arith.truncf %39 : vector<2x8x32xf32> to vector<2x8x32xbf16>
    "tpu.trace_start"() <{level = 10 : i32, message = "bqd,bkd->bqk"}> : () -> ()
    %cst_15 = arith.constant dense<0.000000e+00> : vector<2x8x8xf32>
    %41 = tpu.matmul %36, %38, %cst_15 {dimension_numbers = #tpu.dot_dimension_numbers<[2], [2], [1], [1], [0, 0, 0, 1, 1, 1], [0], [0]>} : vector<2x8x32xbf16>, vector<2x8x32xbf16>, vector<2x8x8xf32> -> vector<2x8x8xf32>
    "tpu.trace_stop"() : () -> ()
    %cst_16 = arith.constant 0.176776692 : f32
    %42 = vector.broadcast %cst_16 : f32 to vector<2x8x8xf32>
    %43 = arith.mulf %41, %42 : vector<2x8x8xf32>
    %cst_17 = arith.constant dense<0xFF800000> : vector<2x8xf32>
    %44 = vector.multi_reduction <maximumf>, %43, %cst_17 [2] : vector<2x8x8xf32> to vector<2x8xf32>
    %45 = vector.shape_cast %44 : vector<2x8xf32> to vector<2x8x1xf32>
    %46 = vector.broadcast %45 : vector<2x8x1xf32> to vector<2x8x8xf32>
    %47 = arith.subf %43, %46 : vector<2x8x8xf32>
    %48 = math.exp %47 : vector<2x8x8xf32>
    %cst_18 = arith.constant dense<0.000000e+00> : vector<2x8xf32>
    %49 = vector.multi_reduction <add>, %48, %cst_18 [2] : vector<2x8x8xf32> to vector<2x8xf32>
    %50 = vector.shape_cast %49 : vector<2x8xf32> to vector<2x8x1xf32>
    %51 = vector.broadcast %50 : vector<2x8x1xf32> to vector<2x8x8xf32>
    %52 = arith.divf %48, %51 : vector<2x8x8xf32>
    %53 = arith.truncf %52 : vector<2x8x8xf32> to vector<2x8x8xbf16>
    "tpu.trace_start"() <{level = 10 : i32, message = "bqk,bkd->bqd"}> : () -> ()
    %cst_19 = arith.constant dense<0.000000e+00> : vector<2x8x32xf32>
    %54 = tpu.matmul %53, %40, %cst_19 {dimension_numbers = #tpu.dot_dimension_numbers<[2], [1], [1], [2], [0, 0, 0, 1, 1, 2], [0], [0]>} : vector<2x8x8xbf16>, vector<2x8x32xbf16>, vector<2x8x32xf32> -> vector<2x8x32xf32>
    "tpu.trace_stop"() : () -> ()
    %55 = vector.shape_cast %54 : vector<2x8x32xf32> to vector<16x32xf32>
    %56 = arith.truncf %55 : vector<16x32xf32> to vector<16x32xbf16>
    %c32 = arith.constant 32 : index
    %c0_20 = arith.constant 0 : index
    %57 = vector.load %arg4[%c32, %c0_20] : memref<128x128xbf16, #tpu.memory_space<vmem>>, vector<32x128xbf16>
    %cst_21 = arith.constant dense<0.000000e+00> : vector<16x128xf32>
    %58 = tpu.matmul %56, %57, %cst_21 {dimension_numbers = #tpu.dot_dimension_numbers<[1], [0], [0], [1], [0, 0, 1, 1], [], []>} : vector<16x32xbf16>, vector<32x128xbf16>, vector<16x128xf32> -> vector<16x128xf32>
    %59 = arith.addf %34, %58 : vector<16x128xf32>
    %60 = vector.extract_strided_slice %8 {offsets = [0, 0, 64], sizes = [2, 8, 32], strides = [1, 1, 1]} : vector<2x8x384xf32> to vector<2x8x32xf32>
    %61 = arith.truncf %60 : vector<2x8x32xf32> to vector<2x8x32xbf16>
    %62 = vector.extract_strided_slice %8 {offsets = [0, 0, 192], sizes = [2, 8, 32], strides = [1, 1, 1]} : vector<2x8x384xf32> to vector<2x8x32xf32>
    %63 = arith.truncf %62 : vector<2x8x32xf32> to vector<2x8x32xbf16>
    %64 = vector.extract_strided_slice %8 {offsets = [0, 0, 320], sizes = [2, 8, 32], strides = [1, 1, 1]} : vector<2x8x384xf32> to vector<2x8x32xf32>
    %65 = arith.truncf %64 : vector<2x8x32xf32> to vector<2x8x32xbf16>
    "tpu.trace_start"() <{level = 10 : i32, message = "bqd,bkd->bqk"}> : () -> ()
    %cst_22 = arith.constant dense<0.000000e+00> : vector<2x8x8xf32>
    %66 = tpu.matmul %61, %63, %cst_22 {dimension_numbers = #tpu.dot_dimension_numbers<[2], [2], [1], [1], [0, 0, 0, 1, 1, 1], [0], [0]>} : vector<2x8x32xbf16>, vector<2x8x32xbf16>, vector<2x8x8xf32> -> vector<2x8x8xf32>
    "tpu.trace_stop"() : () -> ()
    %cst_23 = arith.constant 0.176776692 : f32
    %67 = vector.broadcast %cst_23 : f32 to vector<2x8x8xf32>
    %68 = arith.mulf %66, %67 : vector<2x8x8xf32>
    %cst_24 = arith.constant dense<0xFF800000> : vector<2x8xf32>
    %69 = vector.multi_reduction <maximumf>, %68, %cst_24 [2] : vector<2x8x8xf32> to vector<2x8xf32>
    %70 = vector.shape_cast %69 : vector<2x8xf32> to vector<2x8x1xf32>
    %71 = vector.broadcast %70 : vector<2x8x1xf32> to vector<2x8x8xf32>
    %72 = arith.subf %68, %71 : vector<2x8x8xf32>
    %73 = math.exp %72 : vector<2x8x8xf32>
    %cst_25 = arith.constant dense<0.000000e+00> : vector<2x8xf32>
    %74 = vector.multi_reduction <add>, %73, %cst_25 [2] : vector<2x8x8xf32> to vector<2x8xf32>
    %75 = vector.shape_cast %74 : vector<2x8xf32> to vector<2x8x1xf32>
    %76 = vector.broadcast %75 : vector<2x8x1xf32> to vector<2x8x8xf32>
    %77 = arith.divf %73, %76 : vector<2x8x8xf32>
    %78 = arith.truncf %77 : vector<2x8x8xf32> to vector<2x8x8xbf16>
    "tpu.trace_start"() <{level = 10 : i32, message = "bqk,bkd->bqd"}> : () -> ()
    %cst_26 = arith.constant dense<0.000000e+00> : vector<2x8x32xf32>
    %79 = tpu.matmul %78, %65, %cst_26 {dimension_numbers = #tpu.dot_dimension_numbers<[2], [1], [1], [2], [0, 0, 0, 1, 1, 2], [0], [0]>} : vector<2x8x8xbf16>, vector<2x8x32xbf16>, vector<2x8x32xf32> -> vector<2x8x32xf32>
    "tpu.trace_stop"() : () -> ()
    %80 = vector.shape_cast %79 : vector<2x8x32xf32> to vector<16x32xf32>
    %81 = arith.truncf %80 : vector<16x32xf32> to vector<16x32xbf16>
    %c64 = arith.constant 64 : index
    %c0_27 = arith.constant 0 : index
    %82 = vector.load %arg4[%c64, %c0_27] : memref<128x128xbf16, #tpu.memory_space<vmem>>, vector<32x128xbf16>
    %cst_28 = arith.constant dense<0.000000e+00> : vector<16x128xf32>
    %83 = tpu.matmul %81, %82, %cst_28 {dimension_numbers = #tpu.dot_dimension_numbers<[1], [0], [0], [1], [0, 0, 1, 1], [], []>} : vector<16x32xbf16>, vector<32x128xbf16>, vector<16x128xf32> -> vector<16x128xf32>
    %84 = arith.addf %59, %83 : vector<16x128xf32>
    %85 = vector.extract_strided_slice %8 {offsets = [0, 0, 96], sizes = [2, 8, 32], strides = [1, 1, 1]} : vector<2x8x384xf32> to vector<2x8x32xf32>
    %86 = arith.truncf %85 : vector<2x8x32xf32> to vector<2x8x32xbf16>
    %87 = vector.extract_strided_slice %8 {offsets = [0, 0, 224], sizes = [2, 8, 32], strides = [1, 1, 1]} : vector<2x8x384xf32> to vector<2x8x32xf32>
    %88 = arith.truncf %87 : vector<2x8x32xf32> to vector<2x8x32xbf16>
    %89 = vector.extract_strided_slice %8 {offsets = [0, 0, 352], sizes = [2, 8, 32], strides = [1, 1, 1]} : vector<2x8x384xf32> to vector<2x8x32xf32>
    %90 = arith.truncf %89 : vector<2x8x32xf32> to vector<2x8x32xbf16>
    "tpu.trace_start"() <{level = 10 : i32, message = "bqd,bkd->bqk"}> : () -> ()
    %cst_29 = arith.constant dense<0.000000e+00> : vector<2x8x8xf32>
    %91 = tpu.matmul %86, %88, %cst_29 {dimension_numbers = #tpu.dot_dimension_numbers<[2], [2], [1], [1], [0, 0, 0, 1, 1, 1], [0], [0]>} : vector<2x8x32xbf16>, vector<2x8x32xbf16>, vector<2x8x8xf32> -> vector<2x8x8xf32>
    "tpu.trace_stop"() : () -> ()
    %cst_30 = arith.constant 0.176776692 : f32
    %92 = vector.broadcast %cst_30 : f32 to vector<2x8x8xf32>
    %93 = arith.mulf %91, %92 : vector<2x8x8xf32>
    %cst_31 = arith.constant dense<0xFF800000> : vector<2x8xf32>
    %94 = vector.multi_reduction <maximumf>, %93, %cst_31 [2] : vector<2x8x8xf32> to vector<2x8xf32>
    %95 = vector.shape_cast %94 : vector<2x8xf32> to vector<2x8x1xf32>
    %96 = vector.broadcast %95 : vector<2x8x1xf32> to vector<2x8x8xf32>
    %97 = arith.subf %93, %96 : vector<2x8x8xf32>
    %98 = math.exp %97 : vector<2x8x8xf32>
    %cst_32 = arith.constant dense<0.000000e+00> : vector<2x8xf32>
    %99 = vector.multi_reduction <add>, %98, %cst_32 [2] : vector<2x8x8xf32> to vector<2x8xf32>
    %100 = vector.shape_cast %99 : vector<2x8xf32> to vector<2x8x1xf32>
    %101 = vector.broadcast %100 : vector<2x8x1xf32> to vector<2x8x8xf32>
    %102 = arith.divf %98, %101 : vector<2x8x8xf32>
    %103 = arith.truncf %102 : vector<2x8x8xf32> to vector<2x8x8xbf16>
    "tpu.trace_start"() <{level = 10 : i32, message = "bqk,bkd->bqd"}> : () -> ()
    %cst_33 = arith.constant dense<0.000000e+00> : vector<2x8x32xf32>
    %104 = tpu.matmul %103, %90, %cst_33 {dimension_numbers = #tpu.dot_dimension_numbers<[2], [1], [1], [2], [0, 0, 0, 1, 1, 2], [0], [0]>} : vector<2x8x8xbf16>, vector<2x8x32xbf16>, vector<2x8x32xf32> -> vector<2x8x32xf32>
    "tpu.trace_stop"() : () -> ()
    %105 = vector.shape_cast %104 : vector<2x8x32xf32> to vector<16x32xf32>
    %106 = arith.truncf %105 : vector<16x32xf32> to vector<16x32xbf16>
    %c96 = arith.constant 96 : index
    %c0_34 = arith.constant 0 : index
    %107 = vector.load %arg4[%c96, %c0_34] : memref<128x128xbf16, #tpu.memory_space<vmem>>, vector<32x128xbf16>
    %cst_35 = arith.constant dense<0.000000e+00> : vector<16x128xf32>
    %108 = tpu.matmul %106, %107, %cst_35 {dimension_numbers = #tpu.dot_dimension_numbers<[1], [0], [0], [1], [0, 0, 1, 1], [], []>} : vector<16x32xbf16>, vector<32x128xbf16>, vector<16x128xf32> -> vector<16x128xf32>
    %109 = arith.addf %84, %108 : vector<16x128xf32>
    %c0_36 = arith.constant 0 : index
    %c0_37 = arith.constant 0 : index
    %110 = vector.load %arg5[%c0_36, %c0_37] : memref<1x128xf32, #tpu.memory_space<vmem>>, vector<1x128xf32>
    %111 = vector.broadcast %110 : vector<1x128xf32> to vector<16x128xf32>
    %112 = arith.addf %109, %111 : vector<16x128xf32>
    %113 = arith.addf %1, %112 : vector<16x128xf32>
    %cst_38 = arith.constant dense<0.000000e+00> : vector<16xf32>
    %114 = vector.multi_reduction <add>, %113, %cst_38 [1] : vector<16x128xf32> to vector<16xf32>
    %115 = vector.shape_cast %114 : vector<16xf32> to vector<16x1xf32>
    %cst_39 = arith.constant 1.280000e+02 : f32
    %116 = vector.broadcast %cst_39 : f32 to vector<16x1xf32>
    %117 = arith.divf %115, %116 : vector<16x1xf32>
    %118 = vector.broadcast %117 : vector<16x1xf32> to vector<16x128xf32>
    %119 = arith.subf %113, %118 : vector<16x128xf32>
    %120 = arith.mulf %119, %119 : vector<16x128xf32>
    %cst_40 = arith.constant dense<0.000000e+00> : vector<16xf32>
    %121 = vector.multi_reduction <add>, %120, %cst_40 [1] : vector<16x128xf32> to vector<16xf32>
    %122 = vector.shape_cast %121 : vector<16xf32> to vector<16x1xf32>
    %cst_41 = arith.constant 1.280000e+02 : f32
    %123 = vector.broadcast %cst_41 : f32 to vector<16x1xf32>
    %124 = arith.divf %122, %123 : vector<16x1xf32>
    %125 = vector.broadcast %117 : vector<16x1xf32> to vector<16x128xf32>
    %126 = arith.subf %113, %125 : vector<16x128xf32>
    %cst_42 = arith.constant 9.99999996E-13 : f32
    %127 = vector.broadcast %cst_42 : f32 to vector<16x1xf32>
    %128 = arith.addf %124, %127 : vector<16x1xf32>
    %129 = math.rsqrt %128 : vector<16x1xf32>
    %130 = vector.broadcast %129 : vector<16x1xf32> to vector<16x128xf32>
    %131 = arith.mulf %126, %130 : vector<16x128xf32>
    %c0_43 = arith.constant 0 : index
    %c0_44 = arith.constant 0 : index
    %132 = vector.load %arg6[%c0_43, %c0_44] : memref<1x128xf32, #tpu.memory_space<vmem>>, vector<1x128xf32>
    %133 = vector.broadcast %132 : vector<1x128xf32> to vector<16x128xf32>
    %134 = arith.mulf %131, %133 : vector<16x128xf32>
    %c0_45 = arith.constant 0 : index
    %c0_46 = arith.constant 0 : index
    %135 = vector.load %arg7[%c0_45, %c0_46] : memref<1x128xf32, #tpu.memory_space<vmem>>, vector<1x128xf32>
    %136 = vector.broadcast %135 : vector<1x128xf32> to vector<16x128xf32>
    %137 = arith.addf %134, %136 : vector<16x128xf32>
    %138 = vector.shape_cast %137 : vector<16x128xf32> to vector<2x8x128xf32>
    %c0_47 = arith.constant 0 : index
    %c0_48 = arith.constant 0 : index
    %c0_49 = arith.constant 0 : index
    %139 = vector.load %arg8[%c0_47, %c0_48, %c0_49] : memref<2x8x128xf32, #tpu.memory_space<vmem>>, vector<2x8x128xf32>
    tpu.vector_store %arg8[%c0_47, %c0_48, %c0_49], %138 {strides = array<i32>} : memref<2x8x128xf32, #tpu.memory_space<vmem>>, vector<2x8x128xf32>,
    return
  }
  func.func @transform_0(%arg0: i32) -> (i32, i32, i32) {
    %c0_i32 = arith.constant 0 : i32
    %c0_i32_0 = arith.constant 0 : i32
    %c0_i32_1 = arith.constant 0 : i32
    return %arg0, %c0_i32, %c0_i32_0 : i32, i32, i32
  }
  func.func @transform_1(%arg0: i32) -> (i32, i32) {
    %c0_i32 = arith.constant 0 : i32
    %c0_i32_0 = arith.constant 0 : i32
    %c0_i32_1 = arith.constant 0 : i32
    return %c0_i32, %c0_i32_0 : i32, i32
  }
  func.func @transform_2(%arg0: i32) -> (i32, i32) {
    %c0_i32 = arith.constant 0 : i32
    %c0_i32_0 = arith.constant 0 : i32
    %c0_i32_1 = arith.constant 0 : i32
    return %c0_i32, %c0_i32_0 : i32, i32
  }
  func.func @transform_3(%arg0: i32) -> (i32, i32) {
    %c0_i32 = arith.constant 0 : i32
    %c0_i32_0 = arith.constant 0 : i32
    %c0_i32_1 = arith.constant 0 : i32
    return %c0_i32, %c0_i32_0 : i32, i32
  }
  func.func @transform_4(%arg0: i32) -> (i32, i32) {
    %c0_i32 = arith.constant 0 : i32
    %c0_i32_0 = arith.constant 0 : i32
    %c0_i32_1 = arith.constant 0 : i32
    return %c0_i32, %c0_i32_0 : i32, i32
  }
  func.func @transform_5(%arg0: i32) -> (i32, i32) {
    %c0_i32 = arith.constant 0 : i32
    %c0_i32_0 = arith.constant 0 : i32
    %c0_i32_1 = arith.constant 0 : i32
    return %c0_i32, %c0_i32_0 : i32, i32
  }
  func.func @transform_6(%arg0: i32) -> (i32, i32) {
    %c0_i32 = arith.constant 0 : i32
    %c0_i32_0 = arith.constant 0 : i32
    %c0_i32_1 = arith.constant 0 : i32
    return %c0_i32, %c0_i32_0 : i32, i32
  }
  func.func @transform_7(%arg0: i32) -> (i32, i32, i32) {
    %c0_i32 = arith.constant 0 : i32
    %c0_i32_0 = arith.constant 0 : i32
    %c0_i32_1 = arith.constant 0 : i32
    return %arg0, %c0_i32, %c0_i32_0 : i32, i32, i32
  }
}

</mosaic_0001>

<bundles_post_ra>
// kernel: tpu_custom_call.1
= control target key start
LH: loop header
LB: loop body
LE: loop exit
PB: predicated region body
PF: predicated region fallthrough
CT: control target
= control target key end

     0   :  { %12 = vsyncpa [#allocation3], 0  ;;  %s2273_s0 = inlined_call_operand.hbm [shape: f32[2,8,128], index: 0, kind: input, shape index: {}]   ;;  %s2274_s1 = inlined_call_operand.hbm [shape: bf16[128,384], index: 1, kind: input, shape index: {}]   ;;  %s2275_s2 = inlined_call_operand.vmem [shape: f32[1,384], index: 2, kind: input, shape index: {}]   ;;  %s2276_s3 = inlined_call_operand.hbm [shape: bf16[128,128], index: 3, kind: input, shape index: {}]   ;;  %s2277_s4 = inlined_call_operand.vmem [shape: f32[1,128], index: 4, kind: input, shape index: {}]   ;;  %s2278_s5 = inlined_call_operand.vmem [shape: f32[1,128], index: 5, kind: input, shape index: {}]   ;;  %s2279_s6 = inlined_call_operand.vmem [shape: f32[1,128], index: 6, kind: input, shape index: {}]   ;;  %s2280_s7 = inlined_call_operand.hbm [shape: f32[2,8,128], index: 7, kind: output, shape index: {}]  }
   0x1   :  { %13 = vsyncpa [#allocation6], 0 }
   0x2   :  { %14 = vsyncpa [#allocation4], 0  ;;  %s1977_s24 = smov [#allocation5]  }
   0x3   :  { %s32_s25 = sshll.u32 %s1977_s24, 4  ;;  %s33_s25 = int_to_ptr.vmem [resolvable:$true] %s32_s25 }
   0x4   :  { %s1899_s26 = scalar_lea.vmem %s33_s25, 3072  ;;  %p1904_p1 = scmp.lt.s32.totalorder %s33_s25, %s33_s25 }
   0x5   :  { %p1900_p0 = scmp.ne.s32.totalorder %s33_s25, %s1899_s26  ;;  %p1905_p2 = scmp.lt.s32.totalorder %s1899_s26, %s1899_s26 }
   0x7   :  { %p1906_p3 = por %p1905_p2, %p1904_p1 }
   0x9   :  { %p1907_p4 = pnand %p1906_p3, %p1900_p0 }
   0xb   :  { %1910 = shalt.err (!%p1907_p4)
}
   0xc   :  { %s1978_s27 = smov 192   ;;  %s1979_s28 = smov 12  }
   0xd   :  { %38 = dma.hbm_to_vmem [thread:$0]  %s2274_s1, 3072, %s33_s25, [#allocation6], %s1978_s27, %s1978_s27, %s1979_s28  }
   0xe   :  { %s1980_s8 = smov [#allocation2]  }
   0xf   :  { %s20_s9 = sshll.u32 %s1980_s8, 4  ;;  %s21_s9 = int_to_ptr.vmem [resolvable:$true] %s20_s9 }
  0x10   :  { %s1919_s10 = scalar_lea.vmem %s21_s9, 256  ;;  %p1924_p6 = scmp.lt.s32.totalorder %s21_s9, %s21_s9 }
  0x11   :  { %p1920_p5 = scmp.ne.s32.totalorder %s21_s9, %s1919_s10  ;;  %p1925_p7 = scmp.lt.s32.totalorder %s1919_s10, %s1919_s10 }
  0x13   :  { %p1926_p8 = por %p1925_p7, %p1924_p6 }
  0x15   :  { %p1927_p9 = pnand %p1926_p8, %p1920_p5 }
  0x17   :  { %1930 = shalt.err (!%p1927_p9)
}
  0x18   :  { %s1981_s11 = smov 128   ;;  %s1982_s12 = smov 8  }
  0x19   :  { %26 = dma.hbm_to_vmem [thread:$0]  %s2273_s0, 256, %s21_s9, [#allocation3], %s1981_s11, %s1981_s11, %s1982_s12  }
  0x1a   :  { %s1983_s1 = smov [#allocation7]  }
  0x1b   :  { %s46_s15 = sshll.u32 %s1983_s1, 4  ;;  %s47_s15 = int_to_ptr.vmem [resolvable:$true] %s46_s15 }
  0x1c   :  { %s1939_s16 = scalar_lea.vmem %s47_s15, 1024  ;;  %p1944_p11 = scmp.lt.s32.totalorder %s47_s15, %s47_s15 }
  0x1d   :  { %p1940_p10 = scmp.ne.s32.totalorder %s47_s15, %s1939_s16  ;;  %p1945_p12 = scmp.lt.s32.totalorder %s1939_s16, %s1939_s16 }
  0x1f   :  { %p1946_p13 = por %p1945_p12, %p1944_p11 }
  0x21   :  { %p1947_p0 = pnand %p1946_p13, %p1940_p10 }
  0x23   :  { %1950 = shalt.err (!%p1947_p0)
}
  0x24   :  { %s1984_s17 = smov 64   ;;  %s1985_s18 = smov 4  }
  0x25   :  { %52 = dma.hbm_to_vmem [thread:$0]  %s2276_s3, 1024, %s47_s15, [#allocation6], %s1984_s17, %s1984_s17, %s1985_s18  }
  0x26   :  { %1971 = dma.done.wait [#allocation3], 256  }
  0x27   :  { %1972 = vsyncadd [#allocation3], 4294967040 }
  0x28   :  { %1973 = dma.done.wait [#allocation6], 4096  }
  0x29   :  { %1974 = vsyncadd [#allocation6], 4294963200  ;;  %v1986_v0 = vmov 0   ;;  %v1987_v1 = vmov 0.0   ;;  %v1815_v2 = vld [vmem:[#allocation5 + $0xac] ss:$12 sps:$4 sm:$0xff]   ;;  %v106_v29 = vlaneseq }
  0x2a   :  { %281 = vmatprep.mubr.bf16.mxu0 %v1986_v0  ;;  %1652 = vmatprep.subr.bf16.mxu1 %v1987_v1  ;;  %v1817_v3 = vld [vmem:[#allocation5 + $0xa8] ss:$12 sps:$4 sm:$0xff]   ;;  %v1820_v5 = vld [vmem:[#allocation5 + $0x90] ss:$12 sps:$4 sm:$0xff]   ;;  %v1823_v7 = vld [vmem:[#allocation5 + $0x78] ss:$12 sps:$4 sm:$0xff]  }
  0x2b   :  { %249 = vmatprep.subr.bf16.mxu0 %v1815_v2  ;;  %v1818_v4 = vld [vmem:[#allocation5 + $0x94] ss:$12 sps:$4 sm:$0xff]   ;;  %v1821_v6 = vld [vmem:[#allocation5 + $0x7c] ss:$12 sps:$4 sm:$0xff]   ;;  %v1824_v8 = vld [vmem:[#allocation5 + $0x64] ss:$12 sps:$4 sm:$0xff]  }
  0x2c   :  { %250 = vmatpush1.bf16.msra.mxu0 %v1817_v3  ;;  %v1826_v9 = vld [vmem:[#allocation5 + $0x60] ss:$12 sps:$4 sm:$0xff]   ;;  %v1839_v11 = vld [vmem:[#allocation5 + $0xb0] ss:$12 sps:$4 sm:$0xff]   ;;  %v1840_v12 = vld [vmem:[#allocation5 + $0x98] ss:$12 sps:$4 sm:$0xff]  }
  0x2d   :  { %251 = vmatprep.subr.bf16.mxu0 %v1818_v4  ;;  %v1827_v10 = vld [vmem:[#allocation5 + $0x4c] ss:$12 sps:$4 sm:$0xff]   ;;  %1653 = vmatpush3.bf16.msra.mxu1 %v1839_v11  ;;  %v1829_v13 = vld [vmem:[#allocation5 + $0x48] ss:$12 sps:$4 sm:$0xff]   ;;  %v1832_v15 = vld [vmem:[#allocation5 + $0x30] ss:$12 sps:$4 sm:$0xff]  }
  0x2e   :  { %1654 = vmatprep.subr.bf16.mxu1 %v1987_v1  ;;  %v1830_v14 = vld [vmem:[#allocation5 + $0x34] ss:$12 sps:$4 sm:$0xff]   ;;  %v1833_v16 = vld [vmem:[#allocation5 + $0x1c] ss:$12 sps:$4 sm:$0xff]   ;;  %v1835_v19 = vld [vmem:[#allocation5 + $0x18] ss:$12 sps:$4 sm:$0xff]  }
  0x2f   :  { %v1841_v17 = vld [vmem:[#allocation5 + $0x80] ss:$12 sps:$4 sm:$0xff]   ;;  %v1842_v18 = vld [vmem:[#allocation5 + $0x68] ss:$12 sps:$4 sm:$0xff]   ;;  %v1836_v20 = vld [vmem:[#allocation5 + $0x4] ss:$12 sps:$4 sm:$0xff]  }
  0x30   :  { %252 = vmatpush1.bf16.msra.mxu0 %v1820_v5  ;;  %v1843_v21 = vld [vmem:[#allocation5 + $0x50] ss:$12 sps:$4 sm:$0xff]   ;;  %v1838_v22 = vld [vmem:[#allocation5] ss:$12 sps:$4 sm:$0xff]   ;;  %v1844_v26 = vld [vmem:[#allocation5 + $0x38] ss:$12 sps:$4 sm:$0xff]  }
  0x31   :  { %253 = vmatprep.subr.bf16.mxu0 %v1821_v6  ;;  %1655 = vmatpush3.bf16.msra.mxu1 %v1840_v12  ;;  %v2050_v23 = vld [vmem:[#allocation2] sm:$0xff]  ;;  %v2052_v24 = vld [vmem:[#allocation2 + $0x8] sm:$0xff]  ;;  %v1845_v27 = vld [vmem:[#allocation5 + $0x20] ss:$12 sps:$4 sm:$0xff]   ;;  %vm1988_vm0 = vmmov 0   ;;  %v107_v30 = vshrl.u32 %v106_v29, 7 }
  0x32   :  { %1656 = vmatprep.subr.bf16.mxu1 %v1987_v1  ;;  %v71_v25 = vpack.c.bf16 %v2052_v24, %v2050_v23  ;;  %v1846_v28 = vld [vmem:[#allocation5 + $0x8] ss:$12 sps:$4 sm:$0xff]   ;;  %1668 = vmatprep.mubr.msk.bf16.mxu1 %vm1988_vm0, %v1987_v1  ;;  %v104_v32 = vld [vmem:[%s2275_s2] sm:$0x7]  ;;  %vm339_vm1 = vcmask 261120   ;;  %s1989_s2 = smov 96  }
  0x33   :  { %v112_v31 = vsub.s32 1, %v107_v30  ;;  %v108_v35 = vsub.s32 0, %v107_v30  ;;  %v116_v50 = vsub.s32 2, %v107_v30  ;;  %vm462_vm2 = vcmask 1043456   ;;  %s1990_s21 = smov 32   ;;  %s1991_s27 = smov [#allocation8]  }
  0x34   :  { %254 = vmatpush1.bf16.msra.mxu0 %v1823_v7  ;;  %vm434_vm3 = vcmask 64512   ;;  %s1531_s28 = sshll.u32 %s1991_s27, 4  ;;  %s1532_s28 = int_to_ptr.vmem [resolvable:$true] %s1531_s28 }
  0x35   :  { %255 = vmatprep.subr.bf16.mxu0 %v1824_v8  ;;  %1657 = vmatpush3.bf16.msra.mxu1 %v1841_v17  ;;  %v113_v33 = vrot.slane %v104_v32, %v112_v31  ;;  %v109_v39 = vrot.slane %v104_v32, %v108_v35  ;;  %v117_v51 = vrot.slane %v104_v32, %v116_v50  ;;  %s1951_s29 = scalar_lea.vmem %s1532_s28, 256  ;;  %p1956_p2 = scmp.lt.s32.totalorder %s1532_s28, %s1532_s28 }
  0x36   :  { %1658 = vmatprep.subr.bf16.mxu1 %v1987_v1  ;;  %p1952_p1 = scmp.ne.s32.totalorder %s1532_s28, %s1951_s29  ;;  %p1957_p3 = scmp.lt.s32.totalorder %s1951_s29, %s1951_s29 }
  0x38   :  { %256 = vmatpush1.bf16.msra.mxu0 %v1826_v9  ;;  %p1958_p4 = por %p1957_p3, %p1956_p2 }
  0x39   :  { %257 = vmatprep.subr.bf16.mxu0 %v1827_v10  ;;  %1659 = vmatpush3.bf16.msra.mxu1 %v1842_v18 }
  0x3a   :  { %1660 = vmatprep.subr.bf16.mxu1 %v1987_v1  ;;  %p1959_p5 = pnand %p1958_p4, %p1952_p1 }
  0x3c   :  { %258 = vmatpush1.bf16.msra.mxu0 %v1829_v13 }
  0x3d   :  { %259 = vmatprep.subr.bf16.mxu0 %v1830_v14  ;;  %1661 = vmatpush3.bf16.msra.mxu1 %v1843_v21 }
  0x3e   :  { %1662 = vmatprep.subr.bf16.mxu1 %v1987_v1 }
  0x40   :  { %260 = vmatpush1.bf16.msra.mxu0 %v1832_v15 }
  0x41   :  { %261 = vmatprep.subr.bf16.mxu0 %v1833_v16  ;;  %1663 = vmatpush3.bf16.msra.mxu1 %v1844_v26 }
  0x42   :  { %1664 = vmatprep.subr.bf16.mxu1 %v1987_v1 }
  0x44   :  { %262 = vmatpush1.bf16.msra.mxu0 %v1835_v19 }
  0x45   :  { %263 = vmatprep.subr.bf16.mxu0 %v1836_v20  ;;  %1665 = vmatpush3.bf16.msra.mxu1 %v1845_v27 }
  0x46   :  { %1666 = vmatprep.subr.bf16.mxu1 %v1987_v1 }
  0x48   :  { %264 = vmatpush1.bf16.msra.mxu0 %v1838_v22 }
  0x49   :  { %1672 = vmatprep.subr.bf16.mxu0 %v1987_v1  ;;  %1667 = vmatpush3.bf16.msra.mxu1 %v1846_v28 }
  0x4a   :  { %1678 = vmatprep.subr.bf16.mxu1 %v1987_v1 }
  0x4b   :  { %282 = vmatmul.mubr.bf16.vlgmr.msra.gmra.mxu0 %v71_v25 }
  0x4c   :  { %1674 = vmatprep.mubr.msk.bf16.mxu0 %vm1988_vm0, %v1987_v1  ;;  %1669 = vmatmul.mubr.bf16.vlgmr.msra.gmra.mxu1 %v71_v25 }
  0x4d   :  { %1680 = vmatprep.mubr.msk.bf16.mxu1 %vm1988_vm0, %v1987_v1 }
 0x10b   :  { %v283_v34 = vpop.f32.mrf.mxu0 }
 0x10c   :  { %v284_v44 = vadd.f32 %v283_v34, %v109_v39  ;;  %v326_v52 = vpop.f32.mrf.mxu1 }
 0x10d   :  { %v285_v36 = vpop.f32.mrf.mxu0  ;;  %v327_v54 = vadd.f32 %v326_v52, %v117_v51 }
 0x10e   :  { %v286_v37 = vadd.f32 %v285_v36, %v113_v33  ;;  %v2082_v47 = vpack.c.bf16 %v284_v44, %v284_v44  ;;  %v1670_v53 = vpop.f32.mrf.mxu1 }
 0x10f   :  { %v287_v38 = vpop.f32.mrf.mxu0  ;;  %v2095_v58 = vpack.c.bf16 %v327_v54, %v327_v54 }
 0x110   :  { %v2071_v40 = vpack.c.bf16 %v286_v37, %v286_v37  ;;  %v288_v48 = vadd.f32 %v287_v38, %v109_v39  ;;  %v329_v55 = vpop.f32.mrf.mxu1 }
 0x111   :  { %v289_v41 = vpop.f32.mrf.mxu0  ;;  %v330_v56 = vadd.f32 %v329_v55, %v117_v51  ;;  %v464_v60 = vsel %vm462_vm2, %v2095_v58, 0 }
 0x112   :  { %v290_v42 = vadd.f32 %v289_v41, %v113_v33  ;;  %v344_v43 = vsel %vm339_vm1, %v2071_v40, 0  ;;  %v2089_v49 = vpack.c.bf16 %v288_v48, %v288_v48  ;;  %v1671_v57 = vpop.f32.mrf.mxu1 }
 0x113   :  { %1673 = vmatpush3.bf16.xpose.msra.mxu0 %v344_v43  ;;  %v2097_v59 = vpack.c.bf16 %v330_v56, %v330_v56 }
 0x114   :  { %v2075_v45 = vpack.c.bf16 %v290_v42, %v290_v42  ;;  %1684 = vmatprep.subr.bf16.mxu0 %v1987_v1 }
 0x115   :  { %v510_v61 = vsel %vm462_vm2, %v2097_v59, 0 }
 0x116   :  { %613 = vrot.lane.b32.xlu1 %v2075_v45, %s1989_s2  ;;  %v390_v46 = vsel %vm339_vm1, %v2075_v45, 0 }
 0x117   :  { %1679 = vmatpush3.bf16.xpose.msra.mxu1 %v390_v46 }
 0x118   :  { %1690 = vmatprep.subr.bf16.mxu1 %v1987_v1 }
 0x11a   :  { %1675 = vmatmul.mubr.msk.bf16.vlgmr.msra.gmra.mxu0 %vm339_vm1, %v2082_v47 }
 0x11b   :  { %1686 = vmatprep.mubr.msk.bf16.mxu0 %vm1988_vm0, %v1987_v1  ;;  %1685 = vmatpush3.bf16.msra.mxu0 %v464_v60 }
 0x11c   :  { %1696 = vmatprep.subr.bf16.mxu0 %v1987_v1 }
 0x11e   :  { %1681 = vmatmul.mubr.msk.bf16.vlgmr.msra.gmra.mxu1 %vm339_vm1, %v2089_v49 }
 0x11f   :  { %1692 = vmatprep.mubr.msk.bf16.mxu1 %vm1988_vm0, %v1987_v1  ;;  %1691 = vmatpush3.bf16.msra.mxu1 %v510_v61 }
 0x120   :  { %1702 = vmatprep.subr.bf16.mxu1 %v1987_v1 }
 0x188   :  { %v614_v21 = vpop.permute.xlu1 %613 }
 0x189   :  { %v619_v34 = vsel %vm339_vm1, %v614_v21, 0 }
 0x1da   :  { %v380_v62 = vpop.f32.mrf.mxu0 }
 0x1db   :  { %v432_v63 = vmul.f32 0.17677669, %v380_v62 }
 0x1dc   :  { %v1676_v0 = vpop.f32.mrf.mxu0 }
 0x1dd   :  { %v435_v2 = vsel %vm434_vm3, %v432_v63, -inf }
 0x1de   :  { %v426_v3 = vpop.f32.mrf.mxu1  ;;  %436 = vmax.xlane.f32.xlu0 %v435_v2  ;;  %v383_v4 = vpop.f32.mrf.mxu0 }
 0x1df   :  { %v433_v5 = vmul.f32 0.17677669, %v426_v3 }
 0x1e0   :  { %v1677_v6 = vpop.f32.mrf.mxu0  ;;  %v1682_v7 = vpop.f32.mrf.mxu1 }
 0x1e1   :  { %v438_v8 = vsel %vm434_vm3, %v433_v5, -inf }
 0x1e2   :  { %v429_v9 = vpop.f32.mrf.mxu1  ;;  %439 = vmax.xlane.f32.xlu0 %v438_v8 }
 0x1e4   :  { %v1683_v10 = vpop.f32.mrf.mxu1 }
 0x1f8   :  { %561 = vrot.lane.b32.xlu0 %v2071_v40, %s1989_s2 }
 0x267   :  { %v437_v11 = vpop.xlane.xlu0 %436 }
 0x268   :  { %v441_v12 = vsub.f32 %v432_v63, %v437_v11 }
 0x26a   :  { %v443_v13 = vmul.f32 1.442695, %v441_v12 }
 0x26b   :  { %v440_v14 = vpop.xlane.xlu0 %439 }
 0x26c   :  { %1855 = vpow2.f32 %v443_v13  ;;  %v442_v15 = vsub.f32 %v433_v5, %v440_v14 }
 0x26e   :  { %v445_v16 = vmul.f32 1.442695, %v442_v15 }
 0x26f   :  { %v562_v28 = vpop.permute.xlu0 %561 }
 0x270   :  { %1857 = vpow2.f32 %v445_v16  ;;  %v567_v31 = vsel %vm339_vm1, %v562_v28, 0  ;;  %v1848_v28 = vld [vmem:[#allocation7] sm:$0xff]  }
 0x279   :  { %v1856_v17 = vpop.eup %1855 }
 0x27a   :  { %v447_v18 = vsel %vm434_vm3, %v1856_v17, 0.0 }
 0x27b   :  { %448 = vadd.xlane.f32.xlu1 %v447_v18 }
 0x27d   :  { %v1858_v19 = vpop.eup %1857 }
 0x27e   :  { %v450_v20 = vsel %vm434_vm3, %v1858_v19, 0.0 }
 0x27f   :  { %451 = vadd.xlane.f32.xlu1 %v450_v20 }
 0x290   :  { %558 = vrot.lane.b32.xlu1 %v2082_v47, %s1989_s2 }
 0x294   :  { %610 = vrot.lane.b32.xlu1 %v2089_v49, %s1989_s2 }
 0x304   :  { %v449_v22 = vpop.xlane.xlu1 %448 }
 0x305   :  { %1859 = vrcp.f32 %v449_v22 }
 0x308   :  { %v452_v25 = vpop.xlane.xlu1 %451 }
 0x309   :  { %1861 = vrcp.f32 %v452_v25  ;;  %v1847_v25 = vld [vmem:[#allocation7 + $0x8] sm:$0xff]  }
 0x30c   :  { %v559_v35 = vpop.permute.xlu1 %558 }
 0x310   :  { %v611_v36 = vpop.permute.xlu1 %610 }
 0x312   :  { %v1860_v26 = vpop.eup %1859 }
 0x313   :  { %v454_v27 = vmul.f32 %v1860_v26, %v1856_v17 }
 0x315   :  { %v457_v29 = vpack.c.bf16 %v454_v27, %v454_v27 }
 0x316   :  { %v1862_v30 = vpop.eup %1861 }
 0x317   :  { %1687 = vmatmul.mubr.msk.bf16.vlgmr.msra.gmra.mxu0 %vm434_vm3, %v457_v29  ;;  %v456_v32 = vmul.f32 %v1862_v30, %v1858_v19  ;;  %v1849_v19 = vld [vmem:[#allocation7 + $0x18] sm:$0xff]  }
 0x318   :  { %1697 = vmatpush3.bf16.xpose.msra.mxu0 %v567_v31  ;;  %1698 = vmatprep.mubr.msk.bf16.mxu0 %vm1988_vm0, %v1987_v1 }
 0x319   :  { %v458_v33 = vpack.c.bf16 %v456_v32, %v456_v32  ;;  %1708 = vmatprep.subr.bf16.mxu0 %v1987_v1  ;;  %v1850_v32 = vld [vmem:[#allocation7 + $0x10] sm:$0xff]  }
 0x31b   :  { %1693 = vmatmul.mubr.msk.bf16.vlgmr.msra.gmra.mxu1 %vm434_vm3, %v458_v33 }
 0x31c   :  { %1703 = vmatpush3.bf16.xpose.msra.mxu1 %v619_v34  ;;  %1704 = vmatprep.mubr.msk.bf16.mxu1 %vm1988_vm0, %v1987_v1 }
 0x31d   :  { %1714 = vmatprep.subr.bf16.mxu1 %v1987_v1 }
 0x31f   :  { %1699 = vmatmul.mubr.msk.bf16.vlgmr.msra.gmra.mxu0 %vm339_vm1, %v559_v35 }
 0x320   :  { %1710 = vmatprep.mubr.msk.bf16.mxu0 %vm1988_vm0, %v1987_v1 }
 0x323   :  { %1705 = vmatmul.mubr.msk.bf16.vlgmr.msra.gmra.mxu1 %vm339_vm1, %v611_v36 }
 0x324   :  { %1716 = vmatprep.mubr.msk.bf16.mxu1 %vm1988_vm0, %v1987_v1 }
 0x3d7   :  { %v2131_v37 = vpop.f32.mrf.mxu0 }
 0x3d9   :  { %v1688_v38 = vpop.f32.mrf.mxu0 }
 0x3db   :  { %v503_v39 = vpop.f32.mrf.mxu0  ;;  %v2133_v41 = vpop.f32.mrf.mxu1 }
 0x3dc   :  { %v552_v42 = vpack.c.bf16 %v2133_v41, %v2131_v37 }
 0x3dd   :  { %v1689_v43 = vpop.f32.mrf.mxu0  ;;  %v1694_v44 = vpop.f32.mrf.mxu1 }
 0x3df   :  { %v549_v46 = vpop.f32.mrf.mxu1  ;;  %v603_v48 = vpop.f32.mrf.mxu0 }
 0x3e0   :  { %v661_v50 = vmul.f32 0.17677669, %v603_v48 }
 0x3e1   :  { %v1695_v51 = vpop.f32.mrf.mxu1  ;;  %v1700_v52 = vpop.f32.mrf.mxu0 }
 0x3e2   :  { %v663_v53 = vsel %vm434_vm3, %v661_v50, -inf }
 0x3e3   :  { %v655_v54 = vpop.f32.mrf.mxu1  ;;  %664 = vmax.xlane.f32.xlu0 %v663_v53  ;;  %v606_v55 = vpop.f32.mrf.mxu0 }
 0x3e4   :  { %v662_v56 = vmul.f32 0.17677669, %v655_v54 }
 0x3e5   :  { %v1701_v57 = vpop.f32.mrf.mxu0  ;;  %v1706_v60 = vpop.f32.mrf.mxu1 }
 0x3e6   :  { %v666_v61 = vsel %vm434_vm3, %v662_v56, -inf }
 0x3e7   :  { %667 = vmax.xlane.f32.xlu1 %v666_v61  ;;  %v658_v62 = vpop.f32.mrf.mxu1 }
 0x3e9   :  { %v1707_v63 = vpop.f32.mrf.mxu1 }
 0x3f8   :  { %737 = vrot.lane.b32.xlu1 %v2097_v59, %s1989_s2 }
 0x3fc   :  { %904 = vrot.lane.b32.xlu1 %v2071_v40, %s1984_s17 }
 0x400   :  { %954 = vrot.lane.b32.xlu1 %v2075_v45, %s1984_s17 }
 0x404   :  { %952 = vrot.lane.b32.xlu1 %v2089_v49, %s1984_s17 }
 0x46c   :  { %v665_v0 = vpop.xlane.xlu0 %664 }
 0x46d   :  { %v669_v2 = vsub.f32 %v661_v50, %v665_v0 }
 0x46f   :  { %v671_v3 = vmul.f32 1.442695, %v669_v2 }
 0x470   :  { %v668_v4 = vpop.xlane.xlu1 %667 }
 0x471   :  { %1863 = vpow2.f32 %v671_v3  ;;  %v670_v5 = vsub.f32 %v662_v56, %v668_v4 }
 0x473   :  { %v673_v6 = vmul.f32 1.442695, %v670_v5 }
 0x474   :  { %v738_v7 = vpop.permute.xlu1 %737 }
 0x475   :  { %1865 = vpow2.f32 %v673_v6  ;;  %v743_v8 = vsel %vm462_vm2, %v738_v7, 0 }
 0x476   :  { %1715 = vmatpush3.bf16.msra.mxu1 %v743_v8 }
 0x477   :  { %1728 = vmatprep.subr.bf16.mxu1 %v1987_v1 }
 0x478   :  { %v905_v27 = vpop.permute.xlu1 %904 }
 0x479   :  { %v910_v41 = vsel %vm339_vm1, %v905_v27, 0 }
 0x47c   :  { %v955_v29 = vpop.permute.xlu1 %954 }
 0x47d   :  { %v960_v30 = vsel %vm339_vm1, %v955_v29, 0 }
 0x47e   :  { %v1864_v9 = vpop.eup %1863 }
 0x47f   :  { %v675_v10 = vsel %vm434_vm3, %v1864_v9, 0.0 }
 0x480   :  { %676 = vadd.xlane.f32.xlu0 %v675_v10  ;;  %v953_v31 = vpop.permute.xlu1 %952 }
 0x482   :  { %v1866_v11 = vpop.eup %1865 }
 0x483   :  { %v678_v12 = vsel %vm434_vm3, %v1866_v11, 0.0 }
 0x484   :  { %679 = vadd.xlane.f32.xlu0 %v678_v12 }
 0x49a   :  { %688 = vrot.lane.b32.xlu0 %v2095_v58, %s1989_s2 }
 0x49e   :  { %902 = vrot.lane.b32.xlu0 %v2082_v47, %s1984_s17 }
 0x509   :  { %v677_v13 = vpop.xlane.xlu0 %676 }
 0x50a   :  { %1867 = vrcp.f32 %v677_v13 }
 0x50d   :  { %v680_v14 = vpop.xlane.xlu0 %679 }
 0x50e   :  { %1869 = vrcp.f32 %v680_v14 }
 0x511   :  { %v689_v15 = vpop.permute.xlu0 %688 }
 0x512   :  { %v694_v16 = vsel %vm462_vm2, %v689_v15, 0 }
 0x513   :  { %1709 = vmatpush3.bf16.msra.mxu0 %v694_v16 }
 0x514   :  { %1720 = vmatprep.subr.bf16.mxu0 %v1987_v1 }
 0x515   :  { %v903_v46 = vpop.permute.xlu0 %902 }
 0x517   :  { %v1868_v17 = vpop.eup %1867 }
 0x518   :  { %v682_v18 = vmul.f32 %v1868_v17, %v1864_v9 }
 0x51a   :  { %v685_v20 = vpack.c.bf16 %v682_v18, %v682_v18 }
 0x51b   :  { %v1870_v21 = vpop.eup %1869 }
 0x51c   :  { %1711 = vmatmul.mubr.msk.bf16.vlgmr.msra.gmra.mxu0 %vm434_vm3, %v685_v20  ;;  %v684_v22 = vmul.f32 %v1870_v21, %v1866_v11 }
 0x51d   :  { %1721 = vmatpush3.bf16.msra.mxu0 %v1849_v19  ;;  %1724 = vmatprep.mubr.msk.bf16.mxu0 %vm1988_vm0, %v1987_v1 }
 0x51e   :  { %v686_v26 = vpack.c.bf16 %v684_v22, %v684_v22  ;;  %1722 = vmatprep.subr.bf16.mxu0 %v1987_v1 }
 0x520   :  { %1717 = vmatmul.mubr.msk.bf16.vlgmr.msra.gmra.mxu1 %vm434_vm3, %v686_v26 }
 0x521   :  { %1729 = vmatpush3.bf16.msra.mxu1 %v1847_v25  ;;  %1732 = vmatprep.mubr.msk.bf16.mxu1 %vm1988_vm0, %v1987_v1 }
 0x522   :  { %1730 = vmatprep.subr.bf16.mxu1 %v1987_v1  ;;  %1723 = vmatpush3.bf16.msra.mxu0 %v1850_v32 }
 0x523   :  { %1736 = vmatprep.subr.bf16.mxu0 %v1987_v1 }
 0x525   :  { %1731 = vmatpush3.bf16.msra.mxu1 %v1848_v28 }
 0x526   :  { %1742 = vmatprep.subr.bf16.mxu1 %v1987_v1 }
 0x528   :  { %1733 = vmatmul.mubr.msk.bf16.vlgmr.msra.gmra.mxu1 %vm339_vm1, %v552_v42 }
 0x529   :  { %1743 = vmatpush3.bf16.xpose.msra.mxu1 %v960_v30  ;;  %1744 = vmatprep.mubr.msk.bf16.mxu1 %vm1988_vm0, %v1987_v1 }
 0x52a   :  { %1754 = vmatprep.subr.bf16.mxu1 %v1987_v1 }
 0x530   :  { %1745 = vmatmul.mubr.msk.bf16.vlgmr.msra.gmra.mxu1 %vm339_vm1, %v953_v31 }
 0x531   :  { %1756 = vmatprep.mubr.msk.bf16.mxu1 %vm1988_vm0, %v1987_v1 }
 0x5dc   :  { %v730_v33 = vpop.f32.mrf.mxu0 }
 0x5de   :  { %v1712_v34 = vpop.f32.mrf.mxu0 }
 0x5df   :  { %v1851_v34 = vld [vmem:[#allocation7 + $0x28] sm:$0xff]  }
 0x5e0   :  { %v733_v35 = vpop.f32.mrf.mxu0  ;;  %v779_v36 = vpop.f32.mrf.mxu1 }
 0x5e1   :  { %v785_v37 = vpack.c.bf16 %v779_v36, %v730_v33  ;;  %v1852_v35 = vld [vmem:[#allocation7 + $0x20] sm:$0xff]  }
 0x5e2   :  { %v1713_v38 = vpop.f32.mrf.mxu0  ;;  %v1718_v39 = vpop.f32.mrf.mxu1 }
 0x5e3   :  { %1725 = vmatmul.mubr.msk.bf16.vlgmr.msra.gmra.mxu0 %vm339_vm1, %v785_v37 }
 0x5e4   :  { %1737 = vmatpush3.bf16.xpose.msra.mxu0 %v910_v41  ;;  %v782_v42 = vpop.f32.mrf.mxu1  ;;  %1738 = vmatprep.mubr.msk.bf16.mxu0 %vm1988_vm0, %v1987_v1 }
 0x5e5   :  { %1748 = vmatprep.subr.bf16.mxu0 %v1987_v1 }
 0x5e6   :  { %v1719_v43 = vpop.f32.mrf.mxu1 }
 0x5e8   :  { %v2183_v44 = vpop.f32.mrf.mxu1 }
 0x5ea   :  { %v1734_v48 = vpop.f32.mrf.mxu1 }
 0x5eb   :  { %1739 = vmatmul.mubr.msk.bf16.vlgmr.msra.gmra.mxu0 %vm339_vm1, %v903_v46 }
 0x5ec   :  { %v2186_v50 = vpop.f32.mrf.mxu1  ;;  %1750 = vmatprep.mubr.msk.bf16.mxu0 %vm1988_vm0, %v1987_v1 }
 0x5ee   :  { %v1735_v51 = vpop.f32.mrf.mxu1 }
 0x5f0   :  { %v996_v52 = vpop.f32.mrf.mxu1 }
 0x5f1   :  { %v1003_v53 = vmul.f32 0.17677669, %v996_v52 }
 0x5f2   :  { %v1746_v54 = vpop.f32.mrf.mxu1 }
 0x5f3   :  { %v1007_v55 = vsel %vm434_vm3, %v1003_v53, -inf }
 0x5f4   :  { %1008 = vmax.xlane.f32.xlu1 %v1007_v55  ;;  %v999_v56 = vpop.f32.mrf.mxu1 }
 0x5f6   :  { %v1747_v57 = vpop.f32.mrf.mxu1 }
 0x605   :  { %1076 = vrot.lane.b32.xlu1 %v2097_v59, %s1984_s17 }
 0x609   :  { %1189 = vrot.lane.b32.xlu1 %v2071_v40, %s1990_s21 }
 0x60d   :  { %1239 = vrot.lane.b32.xlu1 %v2075_v45, %s1990_s21 }
 0x611   :  { %1237 = vrot.lane.b32.xlu1 %v2089_v49, %s1990_s21 }
 0x67d   :  { %v1009_v60 = vpop.xlane.xlu1 %1008 }
 0x67e   :  { %v1011_v63 = vsub.f32 %v1003_v53, %v1009_v60 }
 0x680   :  { %v1014_v0 = vmul.f32 1.442695, %v1011_v63 }
 0x681   :  { %v1077_v61 = vpop.permute.xlu1 %1076 }
 0x682   :  { %v1082_v62 = vsel %vm462_vm2, %v1077_v61, 0  ;;  %1871 = vpow2.f32 %v1014_v0 }
 0x683   :  { %1755 = vmatpush3.bf16.msra.mxu1 %v1082_v62 }
 0x684   :  { %1768 = vmatprep.subr.bf16.mxu1 %v1987_v1 }
 0x685   :  { %v1190_v19 = vpop.permute.xlu1 %1189 }
 0x686   :  { %v1195_v21 = vsel %vm339_vm1, %v1190_v19, 0 }
 0x689   :  { %v1240_v43 = vpop.permute.xlu1 %1239 }
 0x68a   :  { %v1245_v52 = vsel %vm339_vm1, %v1240_v43, 0 }
 0x68d   :  { %v1238_v55 = vpop.permute.xlu1 %1237 }
 0x68f   :  { %v1872_v7 = vpop.eup %1871 }
 0x690   :  { %v1019_v10 = vsel %vm434_vm3, %v1872_v7, 0.0 }
 0x6a3   :  { %v2201_v2 = vpop.f32.mrf.mxu0 }
 0x6a4   :  { %v896_v63 = vadd.f32 %v2183_v44, %v2201_v2 }
 0x6a5   :  { %v1726_v3 = vpop.f32.mrf.mxu0 }
 0x6a7   :  { %v2203_v40 = vpop.f32.mrf.mxu0 }
 0x6a9   :  { %v1727_v4 = vpop.f32.mrf.mxu0 }
 0x6ab   :  { %v946_v45 = vpop.f32.mrf.mxu0 }
 0x6ac   :  { %v1002_v5 = vmul.f32 0.17677669, %v946_v45  ;;  %v899_v45 = vadd.f32 %v2186_v50, %v2203_v40 }
 0x6ad   :  { %v1740_v6 = vpop.f32.mrf.mxu0 }
 0x6ae   :  { %v1004_v49 = vsel %vm434_vm3, %v1002_v5, -inf }
 0x6af   :  { %1005 = vmax.xlane.f32.xlu0 %v1004_v49  ;;  %v949_v8 = vpop.f32.mrf.mxu0 }
 0x6b1   :  { %v1741_v9 = vpop.f32.mrf.mxu0 }
 0x6b3   :  { %1020 = vadd.xlane.f32.xlu0 %v1019_v10 }
 0x738   :  { %v1006_v11 = vpop.xlane.xlu0 %1005 }
 0x739   :  { %v1010_v12 = vsub.f32 %v1002_v5, %v1006_v11 }
 0x73b   :  { %v1012_v13 = vmul.f32 1.442695, %v1010_v12 }
 0x73c   :  { %v1021_v14 = vpop.xlane.xlu0 %1020 }
 0x73d   :  { %1873 = vpow2.f32 %v1012_v13 }
 0x73e   :  { %1875 = vrcp.f32 %v1021_v14 }
 0x74a   :  { %v1874_v15 = vpop.eup %1873 }
 0x74b   :  { %v1876_v16 = vpop.eup %1875  ;;  %v1016_v17 = vsel %vm434_vm3, %v1874_v15, 0.0 }
 0x74c   :  { %1017 = vadd.xlane.f32.xlu0 %v1016_v17  ;;  %v1025_v18 = vmul.f32 %v1876_v16, %v1872_v7 }
 0x74e   :  { %v1027_v20 = vpack.c.bf16 %v1025_v18, %v1025_v18 }
 0x750   :  { %1757 = vmatmul.mubr.msk.bf16.vlgmr.msra.gmra.mxu1 %vm434_vm3, %v1027_v20 }
 0x751   :  { %1769 = vmatpush3.bf16.xpose.msra.mxu1 %v1195_v21  ;;  %1770 = vmatprep.mubr.msk.bf16.mxu1 %vm1988_vm0, %v1987_v1 }
 0x752   :  { %1780 = vmatprep.subr.bf16.mxu1 %v1987_v1 }
 0x762   :  { %1028 = vrot.lane.b32.xlu0 %v2095_v58, %s1984_s17 }
 0x766   :  { %1187 = vrot.lane.b32.xlu0 %v2082_v47, %s1990_s21 }
 0x7d5   :  { %v1018_v22 = vpop.xlane.xlu0 %1017 }
 0x7d6   :  { %1877 = vrcp.f32 %v1018_v22 }
 0x7d9   :  { %v1029_v25 = vpop.permute.xlu0 %1028 }
 0x7da   :  { %v1034_v26 = vsel %vm462_vm2, %v1029_v25, 0 }
 0x7db   :  { %1749 = vmatpush3.bf16.msra.mxu0 %v1034_v26  ;;  %v1853_v26 = vld [vmem:[#allocation7 + $0x38] sm:$0xff]  }
 0x7dc   :  { %1760 = vmatprep.subr.bf16.mxu0 %v1987_v1 }
 0x7dd   :  { %v1188_v27 = vpop.permute.xlu0 %1187 }
 0x7de   :  { %1771 = vmatmul.mubr.msk.bf16.vlgmr.msra.gmra.mxu1 %vm339_vm1, %v1188_v27  ;;  %v1854_v27 = vld [vmem:[#allocation7 + $0x30] sm:$0xff]  }
 0x7df   :  { %1782 = vmatprep.mubr.msk.bf16.mxu1 %vm1988_vm0, %v1987_v1 }
 0x7e3   :  { %v1878_v28 = vpop.eup %1877 }
 0x7e4   :  { %v1023_v29 = vmul.f32 %v1878_v28, %v1874_v15 }
 0x7e6   :  { %v1026_v30 = vpack.c.bf16 %v1023_v29, %v1023_v29 }
 0x7e8   :  { %1751 = vmatmul.mubr.msk.bf16.vlgmr.msra.gmra.mxu0 %vm434_vm3, %v1026_v30 }
 0x7e9   :  { %1764 = vmatprep.mubr.msk.bf16.mxu0 %vm1988_vm0, %v1987_v1  ;;  %1761 = vmatpush3.bf16.msra.mxu0 %v1851_v34 }
 0x7ea   :  { %1762 = vmatprep.subr.bf16.mxu0 %v1987_v1 }
 0x7ed   :  { %1763 = vmatpush3.bf16.msra.mxu0 %v1852_v35 }
 0x7ee   :  { %1774 = vmatprep.subr.bf16.mxu0 %v1987_v1 }
 0x810   :  { %v1118_v47 = vpop.f32.mrf.mxu1 }
 0x812   :  { %v1758_v31 = vpop.f32.mrf.mxu1 }
 0x814   :  { %v1121_v32 = vpop.f32.mrf.mxu1 }
 0x816   :  { %v1759_v33 = vpop.f32.mrf.mxu1 }
 0x89e   :  { %v1231_v36 = vpop.f32.mrf.mxu1 }
 0x89f   :  { %v1287_v37 = vmul.f32 0.17677669, %v1231_v36 }
 0x8a0   :  { %v1772_v38 = vpop.f32.mrf.mxu1 }
 0x8a1   :  { %v1289_v39 = vsel %vm434_vm3, %v1287_v37, -inf }
 0x8a2   :  { %1290 = vmax.xlane.f32.xlu0 %v1289_v39  ;;  %v1234_v41 = vpop.f32.mrf.mxu1 }
 0x8a4   :  { %v1773_v42 = vpop.f32.mrf.mxu1 }
 0x8a8   :  { %v1070_v46 = vpop.f32.mrf.mxu0 }
 0x8a9   :  { %v1124_v48 = vpack.c.bf16 %v1118_v47, %v1070_v46 }
 0x8aa   :  { %v1752_v51 = vpop.f32.mrf.mxu0 }
 0x8ab   :  { %1765 = vmatmul.mubr.msk.bf16.vlgmr.msra.gmra.mxu0 %vm339_vm1, %v1124_v48 }
 0x8ac   :  { %1775 = vmatpush3.bf16.xpose.msra.mxu0 %v1245_v52  ;;  %v1073_v53 = vpop.f32.mrf.mxu0  ;;  %1776 = vmatprep.mubr.msk.bf16.mxu0 %vm1988_vm0, %v1987_v1 }
 0x8ad   :  { %1786 = vmatprep.subr.bf16.mxu0 %v1987_v1 }
 0x8ae   :  { %v1753_v54 = vpop.f32.mrf.mxu0 }
 0x8b3   :  { %1777 = vmatmul.mubr.msk.bf16.vlgmr.msra.gmra.mxu0 %vm339_vm1, %v1238_v55 }
 0x8b4   :  { %1788 = vmatprep.mubr.msk.bf16.mxu0 %vm1988_vm0, %v1987_v1 }
 0x92b   :  { %v1291_v56 = vpop.xlane.xlu0 %1290 }
 0x92c   :  { %v1295_v57 = vsub.f32 %v1287_v37, %v1291_v56  ;;  %v1596_v37 = vld [vmem:[%s2277_s4] ss:$0 sm:$0xff] }
 0x92e   :  { %v1297_v60 = vmul.f32 1.442695, %v1295_v57 }
 0x930   :  { %1879 = vpow2.f32 %v1297_v60 }
 0x93d   :  { %v1880_v61 = vpop.eup %1879 }
 0x93e   :  { %v1301_v62 = vsel %vm434_vm3, %v1880_v61, 0.0 }
 0x93f   :  { %1302 = vadd.xlane.f32.xlu0 %v1301_v62 }
 0x96b   :  { %v1178_v0 = vpop.f32.mrf.mxu0 }
 0x96c   :  { %v1185_v3 = vadd.f32 %v1178_v0, %v896_v63 }
 0x96d   :  { %v1766_v4 = vpop.f32.mrf.mxu0 }
 0x96f   :  { %v1181_v5 = vpop.f32.mrf.mxu0 }
 0x970   :  { %v1186_v6 = vadd.f32 %v1181_v5, %v899_v45  ;;  %v1597_v45 = vld [vmem:[%s2278_s5] ss:$0 sm:$0xff] }
 0x971   :  { %v1767_v49 = vpop.f32.mrf.mxu0 }
 0x973   :  { %v1281_v7 = vpop.f32.mrf.mxu0 }
 0x974   :  { %v1288_v8 = vmul.f32 0.17677669, %v1281_v7 }
 0x975   :  { %v1778_v9 = vpop.f32.mrf.mxu0 }
 0x976   :  { %v1292_v10 = vsel %vm434_vm3, %v1288_v8, -inf }
 0x977   :  { %1293 = vmax.xlane.f32.xlu1 %v1292_v10  ;;  %v1284_v11 = vpop.f32.mrf.mxu0 }
 0x979   :  { %v1779_v12 = vpop.f32.mrf.mxu0 }
 0x988   :  { %1361 = vrot.lane.b32.xlu1 %v2097_v59, %s1990_s21 }
 0x9c8   :  { %v1303_v16 = vpop.xlane.xlu0 %1302 }
 0xa00   :  { %v1294_v44 = vpop.xlane.xlu1 %1293 }
 0xa01   :  { %v1296_v2 = vsub.f32 %v1288_v8, %v1294_v44 }
 0xa03   :  { %v1299_v13 = vmul.f32 1.442695, %v1296_v2 }
 0xa04   :  { %v1362_v14 = vpop.permute.xlu1 %1361 }
 0xa05   :  { %1881 = vpow2.f32 %v1299_v13  ;;  %v1367_v50 = vsel %vm462_vm2, %v1362_v14, 0 }
 0xa06   :  { %1787 = vmatpush3.bf16.msra.mxu0 %v1367_v50  ;;  %1883 = vrcp.f32 %v1303_v16 }
 0xa12   :  { %v1882_v40 = vpop.eup %1881 }
 0xa13   :  { %v1304_v15 = vsel %vm434_vm3, %v1882_v40, 0.0  ;;  %v1884_v17 = vpop.eup %1883 }
 0xa14   :  { %1305 = vadd.xlane.f32.xlu0 %v1304_v15  ;;  %v1308_v59 = vmul.f32 %v1884_v17, %v1880_v61 }
 0xa16   :  { %v1311_v21 = vpack.c.bf16 %v1308_v59, %v1308_v59 }
 0xa2a   :  { %1313 = vrot.lane.b32.xlu0 %v2095_v58, %s1990_s21 }
 0xa9d   :  { %v1306_v18 = vpop.xlane.xlu0 %1305 }
 0xa9e   :  { %1885 = vrcp.f32 %v1306_v18 }
 0xaa1   :  { %v1314_v19 = vpop.permute.xlu0 %1313 }
 0xaa2   :  { %v1319_v20 = vsel %vm462_vm2, %v1314_v19, 0 }
 0xaa3   :  { %1781 = vmatpush3.bf16.msra.mxu1 %v1319_v20 }
 0xaa4   :  { %1792 = vmatprep.subr.bf16.mxu1 %v1987_v1 }
 0xaa6   :  { %1783 = vmatmul.mubr.msk.bf16.vlgmr.msra.gmra.mxu1 %vm434_vm3, %v1311_v21 }
 0xaa7   :  { %1796 = vmatprep.mubr.msk.bf16.mxu1 %vm1988_vm0, %v1987_v1  ;;  %1793 = vmatpush3.bf16.msra.mxu1 %v1853_v26 }
 0xaa8   :  { %1794 = vmatprep.subr.bf16.mxu1 %v1987_v1 }
 0xaab   :  { %v1886_v22 = vpop.eup %1885  ;;  %1795 = vmatpush3.bf16.msra.mxu1 %v1854_v27 }
 0xaac   :  { %v1310_v58 = vmul.f32 %v1886_v22, %v1882_v40 }
 0xaae   :  { %v1312_v25 = vpack.c.bf16 %v1310_v58, %v1310_v58 }
 0xab0   :  { %1789 = vmatmul.mubr.msk.bf16.vlgmr.msra.gmra.mxu0 %vm434_vm3, %v1312_v25 }
 0xb66   :  { %v1355_v28 = vpop.f32.mrf.mxu1 }
 0xb68   :  { %v1784_v29 = vpop.f32.mrf.mxu1 }
 0xb6a   :  { %v1358_v30 = vpop.f32.mrf.mxu1 }
 0xb6c   :  { %v1785_v47 = vpop.f32.mrf.mxu1 }
 0xb70   :  { %v1403_v31 = vpop.f32.mrf.mxu0 }
 0xb71   :  { %v1409_v32 = vpack.c.bf16 %v1403_v31, %v1355_v28 }
 0xb72   :  { %v1790_v33 = vpop.f32.mrf.mxu0 }
 0xb73   :  { %1797 = vmatmul.mubr.msk.bf16.vlgmr.msra.gmra.mxu1 %vm339_vm1, %v1409_v32 }
 0xb74   :  { %v1406_v34 = vpop.f32.mrf.mxu0 }
 0xb76   :  { %v1791_v35 = vpop.f32.mrf.mxu0 }
 0xc33   :  { %v1463_v36 = vpop.f32.mrf.mxu1 }
 0xc34   :  { %v1470_v38 = vadd.f32 %v1463_v36, %v1185_v3 }
 0xc35   :  { %v1798_v1 = vpop.f32.mrf.mxu1 }
 0xc36   :  { %v1479_v39 = vadd.f32 %v1596_v37, %v1470_v38 }
 0xc37   :  { %v1466_v41 = vpop.f32.mrf.mxu1 }
 0xc38   :  { %v1471_v42 = vadd.f32 %v1466_v41, %v1186_v6  ;;  %v1481_v43 = vadd.f32 %v1479_v39, %v2050_v23  ;;  %v1598_v6 = vld [vmem:[%s2279_s6] ss:$0 sm:$0xff] }
 0xc39   :  { %v1799_v46 = vpop.f32.mrf.mxu1 }
 0xc3a   :  { %v1480_v48 = vadd.f32 %v1596_v37, %v1471_v42  ;;  %1483 = vadd.xlane.f32.xlu1 %v1481_v43 }
 0xc3c   :  { %v1482_v51 = vadd.f32 %v1480_v48, %v2052_v24 }
 0xc3e   :  { %1485 = vadd.xlane.f32.xlu0 %v1482_v51 }
 0xcc3   :  { %v1484_v52 = vpop.xlane.xlu1 %1483 }
 0xcc4   :  { %v1488_v53 = vmul.f32 0.0078125, %v1484_v52 }
 0xcc6   :  { %v1490_v54 = vsub.f32 %v1481_v43, %v1488_v53 }
 0xcc7   :  { %v1486_v55 = vpop.xlane.xlu0 %1485 }
 0xcc8   :  { %v1489_v56 = vmul.f32 0.0078125, %v1486_v55  ;;  %v1492_v57 = vmul.f32 %v1490_v54, %v1490_v54 }
 0xcca   :  { %v1491_v60 = vsub.f32 %v1482_v51, %v1489_v56  ;;  %1494 = vadd.xlane.f32.xlu0 %v1492_v57 }
 0xccc   :  { %v1493_v61 = vmul.f32 %v1491_v60, %v1491_v60 }
 0xcce   :  { %1496 = vadd.xlane.f32.xlu1 %v1493_v61 }
 0xd53   :  { %v1495_v62 = vpop.xlane.xlu0 %1494 }
 0xd54   :  { %v1498_v63 = vmul.f32 0.0078125, %v1495_v62 }
 0xd56   :  { %v1500_v0 = vadd.f32 1e-12, %v1498_v63 }
 0xd57   :  { %v1497_v23 = vpop.xlane.xlu1 %1496 }
 0xd58   :  { %1887 = vrsqrt.f32 %v1500_v0  ;;  %v1499_v3 = vmul.f32 0.0078125, %v1497_v23 }
 0xd5a   :  { %v1501_v4 = vadd.f32 1e-12, %v1499_v3 }
 0xd5c   :  { %1889 = vrsqrt.f32 %v1501_v4 }
 0xd65   :  { %v1888_v24 = vpop.eup %1887 }
 0xd66   :  { %v1504_v5 = vmul.f32 %v1888_v24, %v1490_v54 }
 0xd68   :  { %v1513_v49 = vmul.f32 %v1597_v45, %v1504_v5 }
 0xd69   :  { %v1890_v7 = vpop.eup %1889 }
 0xd6a   :  { %v1505_v8 = vmul.f32 %v1890_v7, %v1491_v60  ;;  %v1522_v9 = vadd.f32 %v1598_v6, %v1513_v49 }
 0xd6c   :  { %v1514_v10 = vmul.f32 %v1597_v45, %v1505_v8  ;;  %1524 = vst [vmem:[#allocation8] sm:$0xff] %v1522_v9 }
 0xd6e   :  { %v1523_v11 = vadd.f32 %v1598_v6, %v1514_v10 }
 0xd70   :  { %1525 = vst [vmem:[#allocation8 + $0x8] sm:$0xff] %v1523_v11 }
 0xd71   :  { %1962 = shalt.err (!%p1959_p5)
}
 0xd72   :  { %1537 = dma.vmem_to_hbm [thread:$0]  %s1532_s28, 256, %s2280_s7, [#allocation4], %s1981_s11, %s1981_s11, %s1982_s12  }
 0xd73   :  { %1975 = dma.done.wait [#allocation4], 256  }
 0xd74   :  { %1976 = vsyncadd [#allocation4], 4294967040 }
 0xd75   :  { %1541 = vsyncpa [#allocation3], 1 }
 0xd76   :  { %1542 = vsyncpa [#allocation6], 1 }
 0xd77   :  { %1543 = vsyncpa [#allocation4], 1 }

</bundles_post_ra>
